<compile_context>
chip_gen: v7x
topology: tpu7x:2x2x1
jax: 0.10.0
libtpu: 0.0.40
codegen_flags: <defaults>
</compile_context>

<pallas_src>
import functools

import jax
import jax.numpy as jnp
from jax.experimental import pallas as pl
from jax.experimental.pallas import tpu as pltpu

_INV_SQRT2 = 0.7071067811865475
_BN_EPS = 1e-5
_VMEM_LIMIT = 64 * 1024 * 1024


def conv_kernel(tap_ref, w_ref, y_ref, part_ref):
    """One M-tile: single folded-K matmul + per-tile BN partial sums.

    tap_ref: (tm, 9*Cin)   w_ref: (9*Cin, Cp)
    y_ref:   (tm, Cp) f32  part_ref: (1, 2, Cp) f32  (row 0 = sum, row 1 = sum of squares)
    """
    y = jnp.dot(tap_ref[...], w_ref[...], preferred_element_type=jnp.float32)
    y_ref[...] = y
    part_ref[0, 0:1, :] = jnp.sum(y, axis=0, keepdims=True)
    part_ref[0, 1:2, :] = jnp.sum(y * y, axis=0, keepdims=True)


def bn_gelu_kernel(y_ref, scale_ref, shift_ref, o_ref):
    """One M-tile: BN affine (precomputed scale/shift) + exact erf GELU."""
    z = y_ref[...] * scale_ref[...] + shift_ref[...]
    z = 0.5 * z * (1.0 + jax.lax.erf(z * _INV_SQRT2))
    o_ref[...] = z.astype(o_ref.dtype)


@functools.partial(jax.jit, static_argnames=("stride", "tile_m"))
def cna_forward(x_nchw, weight, gamma, beta, *, stride=1, tile_m=512):
    """x_nchw: (N, Cin, H, W); weight: (Cout, Cin, 3, 3) (PyTorch OIHW)."""
    N, Cin, H, W = x_nchw.shape
    Cout = weight.shape[0]
    H_out = (H + 2 - 3) // stride + 1
    W_out = (W + 2 - 3) // stride + 1
    M = N * H_out * W_out

    Kf = 9 * Cin                                   # folded contraction dim
    Cp = ((Cout + 127) // 128) * 128               # lane-dense padded channel dim

    # M tiling (multiple of 8 sublanes); pad M with zero rows -> they contribute 0
    # to both BN partial sums, so dividing by the true M keeps the stats exact.
    tm = max(8, (min(tile_m, M) // 8) * 8)
    T = pl.cdiv(M, tm)
    M_pad = T * tm

    # --- plain-JAX glue: NHWC transpose, zero pad, folded im2col (M, 9*Cin) ------
    x = jnp.transpose(x_nchw, (0, 2, 3, 1))                 # NHWC
    xp = jnp.pad(x, ((0, 0), (1, 1), (1, 1), (0, 0)))       # conv padding = 1
    taps = []
    for ky in range(3):
        for kx in range(3):
            win = jax.lax.slice(
                xp,
                (0, ky, kx, 0),
                (N, ky + stride * (H_out - 1) + 1,
                 kx + stride * (W_out - 1) + 1, Cin),
                (1, stride, stride, 1))
            taps.append(win.reshape(M, Cin))
    taps = jnp.concatenate(taps, axis=1)                    # (M, 9*Cin)
    if M_pad != M:
        taps = jnp.pad(taps, ((0, M_pad - M), (0, 0)))

    # weight: OIHW -> (ky, kx, Cin, Cout) -> (9*Cin, Cout) matching tap column order
    w = jnp.transpose(weight, (2, 3, 1, 0)).reshape(Kf, Cout)
    if Cp != Cout:
        w = jnp.pad(w, ((0, 0), (0, Cp - Cout)))            # zero-pad extra channels
    w = w.astype(taps.dtype)                                # bf16 inputs -> bf16 MXU

    # --- pass 1: tiled conv + per-tile BN partial sums ---------------------------
    y_conv, partials = pl.pallas_call(
        conv_kernel,
        out_shape=(
            jax.ShapeDtypeStruct((M_pad, Cp), jnp.float32),
            jax.ShapeDtypeStruct((T, 2, Cp), jnp.float32),
        ),
        grid_spec=pltpu.PrefetchScalarGridSpec(
            num_scalar_prefetch=0,
            grid=(T,),
            in_specs=[
                pl.BlockSpec((tm, Kf), lambda i: (i, 0)),
                pl.BlockSpec((Kf, Cp), lambda i: (0, 0)),
            ],
            out_specs=(
                pl.BlockSpec((tm, Cp), lambda i: (i, 0)),
                pl.BlockSpec((1, 2, Cp), lambda i: (i, 0, 0)),
            ),
        ),
        compiler_params=pltpu.CompilerParams(
            dimension_semantics=("parallel",),
            vmem_limit_bytes=_VMEM_LIMIT),
    )(taps, w)

    # --- tiny reduce: global batch stats -> per-channel BN scale/shift -----------
    totals = jnp.sum(partials, axis=0)                      # (2, Cp)
    mean = totals[0] / M                                    # biased (training-mode) stats
    var = totals[1] / M - mean * mean
    inv = jax.lax.rsqrt(var + _BN_EPS)
    gamma_p = jnp.pad(gamma.astype(jnp.float32), (0, Cp - Cout))
    beta_p = jnp.pad(beta.astype(jnp.float32), (0, Cp - Cout))
    scale = (gamma_p * inv).reshape(1, Cp)
    shift = (beta_p - mean * gamma_p * inv).reshape(1, Cp)

    # --- pass 2: tiled BN affine + exact GELU ------------------------------------
    out2d = pl.pallas_call(
        bn_gelu_kernel,
        out_shape=jax.ShapeDtypeStruct((M_pad, Cp), x_nchw.dtype),
        grid_spec=pltpu.PrefetchScalarGridSpec(
            num_scalar_prefetch=0,
            grid=(T,),
            in_specs=[
                pl.BlockSpec((tm, Cp), lambda i: (i, 0)),
                pl.BlockSpec((1, Cp), lambda i: (0, 0)),
                pl.BlockSpec((1, Cp), lambda i: (0, 0)),
            ],
            out_specs=pl.BlockSpec((tm, Cp), lambda i: (i, 0)),
        ),
        compiler_params=pltpu.CompilerParams(
            dimension_semantics=("parallel",),
            vmem_limit_bytes=_VMEM_LIMIT),
    )(y_conv, scale, shift)

    out = out2d[:M, :Cout].reshape(N, H_out, W_out, Cout)
    return jnp.transpose(out, (0, 3, 1, 2))                 # back to NCHW


def cna_reference(x, weight, gamma, beta, stride=1):
    """Pure-JAX reference mirroring the PyTorch module (training-mode BN)."""
    out = jax.lax.conv_general_dilated(
        x, weight, window_strides=(stride, stride),
        padding=((1, 1), (1, 1)),
        dimension_numbers=("NCHW", "OIHW", "NCHW"))
    mean = jnp.mean(out, axis=(0, 2, 3), keepdims=True)
    var = jnp.mean((out - mean) ** 2, axis=(0, 2, 3), keepdims=True)
    out = (out - mean) / jnp.sqrt(var + _BN_EPS)
    out = out * gamma.reshape(1, -1, 1, 1) + beta.reshape(1, -1, 1, 1)
    return 0.5 * out * (1.0 + jax.lax.erf(out * _INV_SQRT2))


if __name__ == "__main__":
    # small shapes consistent with the module: N=2, in_nc=4, out_nc=8, 16x16 spatial
    N, IN_NC, OUT_NC, H, W = 2, 4, 8, 16, 16
    STRIDE = 1

    key = jax.random.PRNGKey(0)
    kx, kw, kg, kb = jax.random.split(key, 4)
    x = jax.random.normal(kx, (N, IN_NC, H, W), dtype=jnp.float32)
    conv_w = jax.random.normal(kw, (OUT_NC, IN_NC, 3, 3), dtype=jnp.float32) * 0.1
    bn_gamma = 1.0 + 0.1 * jax.random.normal(kg, (OUT_NC,), dtype=jnp.float32)
    bn_beta = 0.1 * jax.random.normal(kb, (OUT_NC,), dtype=jnp.float32)

    # tile_m=128 -> 4 M-tiles at this size: exercises the tiled BN partial-sum path.
    out = cna_forward(x, conv_w, bn_gamma, bn_beta, stride=STRIDE, tile_m=128)
    out = jax.block_until_ready(out)

    ref = cna_reference(x, conv_w, bn_gamma, bn_beta, stride=STRIDE)
    assert out.shape == (N, OUT_NC, H, W), out.shape
    assert jnp.allclose(out, ref, atol=1e-4, rtol=1e-4), (
        float(jnp.max(jnp.abs(out - ref))))

    print("KERNEL_OK")
</pallas_src>

<mosaic_0001>
module attributes {stable_mosaic.version = 11 : i64} {
  func.func @conv_kernel(%arg0: i32, %arg1: memref<128x36xf32, #tpu.memory_space<vmem>>, %arg2: memref<36x128xf32, #tpu.memory_space<vmem>>, %arg3: memref<128x128xf32, #tpu.memory_space<vmem>>, %arg4: memref<1x2x128xf32, #tpu.memory_space<vmem>>) attributes {dimension_semantics = [#tpu.dimension_semantics<parallel>], iteration_bounds = array<i64: 4>, scalar_prefetch = 0 : i64, scratch_operands = 0 : i64, tpu.core_type = #tpu.core_type<tc>, window_params = [{transform_indices = @transform_0, window_bounds = array<i64: 128, 36>}, {pipeline_mode = #tpu.pipeline_mode<synchronous>, transform_indices = @transform_1, window_bounds = array<i64: 36, 128>}, {transform_indices = @transform_2, window_bounds = array<i64: 128, 128>}, {transform_indices = @transform_3, window_bounds = array<i64: 1, 2, 128>}]} {
    %c0 = arith.constant 0 : index
    %c0_0 = arith.constant 0 : index
    %0 = vector.load %arg1[%c0, %c0_0] : memref<128x36xf32, #tpu.memory_space<vmem>>, vector<128x36xf32>
    %c0_1 = arith.constant 0 : index
    %c0_2 = arith.constant 0 : index
    %1 = vector.load %arg2[%c0_1, %c0_2] : memref<36x128xf32, #tpu.memory_space<vmem>>, vector<36x128xf32>
    %cst = arith.constant dense<0.000000e+00> : vector<128x128xf32>
    %2 = tpu.matmul %0, %1, %cst {dimension_numbers = #tpu.dot_dimension_numbers<[1], [0], [0], [1], [0, 0, 1, 1], [], []>} : vector<128x36xf32>, vector<36x128xf32>, vector<128x128xf32> -> vector<128x128xf32>
    %c0_3 = arith.constant 0 : index
    %c0_4 = arith.constant 0 : index
    %3 = vector.load %arg3[%c0_3, %c0_4] : memref<128x128xf32, #tpu.memory_space<vmem>>, vector<128x128xf32>
    tpu.vector_store %arg3[%c0_3, %c0_4], %2 {strides = array<i32>} : memref<128x128xf32, #tpu.memory_space<vmem>>, vector<128x128xf32>,
    %cst_5 = arith.constant dense<0.000000e+00> : vector<128xf32>
    %4 = vector.multi_reduction <add>, %2, %cst_5 [0] : vector<128x128xf32> to vector<128xf32>
    %5 = vector.shape_cast %4 : vector<128xf32> to vector<1x128xf32>
    %c0_6 = arith.constant 0 : index
    %c0_7 = arith.constant 0 : index
    %c0_8 = arith.constant 0 : index
    %6 = vector.load %arg4[%c0_6, %c0_7, %c0_8] : memref<1x2x128xf32, #tpu.memory_space<vmem>>, vector<1x1x128xf32>
    %7 = vector.shape_cast %6 : vector<1x1x128xf32> to vector<1x128xf32>
    %8 = vector.shape_cast %5 : vector<1x128xf32> to vector<1x1x128xf32>
    tpu.vector_store %arg4[%c0_6, %c0_7, %c0_8], %8 {strides = array<i32>} : memref<1x2x128xf32, #tpu.memory_space<vmem>>, vector<1x1x128xf32>,
    %9 = arith.mulf %2, %2 : vector<128x128xf32>
    %cst_9 = arith.constant dense<0.000000e+00> : vector<128xf32>
    %10 = vector.multi_reduction <add>, %9, %cst_9 [0] : vector<128x128xf32> to vector<128xf32>
    %11 = vector.shape_cast %10 : vector<128xf32> to vector<1x128xf32>
    %c0_10 = arith.constant 0 : index
    %c1 = arith.constant 1 : index
    %c0_11 = arith.constant 0 : index
    %12 = vector.load %arg4[%c0_10, %c1, %c0_11] : memref<1x2x128xf32, #tpu.memory_space<vmem>>, vector<1x1x128xf32>
    %13 = vector.shape_cast %12 : vector<1x1x128xf32> to vector<1x128xf32>
    %14 = vector.shape_cast %11 : vector<1x128xf32> to vector<1x1x128xf32>
    tpu.vector_store %arg4[%c0_10, %c1, %c0_11], %14 {strides = array<i32>} : memref<1x2x128xf32, #tpu.memory_space<vmem>>, vector<1x1x128xf32>,
    return
  }
  func.func @transform_0(%arg0: i32) -> (i32, i32) {
    %c0_i32 = arith.constant 0 : i32
    %c0_i32_0 = arith.constant 0 : i32
    return %arg0, %c0_i32 : i32, i32
  }
  func.func @transform_1(%arg0: i32) -> (i32, i32) {
    %c0_i32 = arith.constant 0 : i32
    %c0_i32_0 = arith.constant 0 : i32
    %c0_i32_1 = arith.constant 0 : i32
    return %c0_i32, %c0_i32_0 : i32, i32
  }
  func.func @transform_2(%arg0: i32) -> (i32, i32) {
    %c0_i32 = arith.constant 0 : i32
    %c0_i32_0 = arith.constant 0 : i32
    return %arg0, %c0_i32 : i32, i32
  }
  func.func @transform_3(%arg0: i32) -> (i32, i32, i32) {
    %c0_i32 = arith.constant 0 : i32
    %c0_i32_0 = arith.constant 0 : i32
    %c0_i32_1 = arith.constant 0 : i32
    return %arg0, %c0_i32, %c0_i32_0 : i32, i32, i32
  }
}

module attributes {stable_mosaic.version = 11 : i64} {
  func.func @bn_gelu_kernel(%arg0: i32, %arg1: memref<128x128xf32, #tpu.memory_space<vmem>>, %arg2: memref<1x128xf32, #tpu.memory_space<vmem>>, %arg3: memref<1x128xf32, #tpu.memory_space<vmem>>, %arg4: memref<128x128xf32, #tpu.memory_space<vmem>>) attributes {dimension_semantics = [#tpu.dimension_semantics<parallel>], iteration_bounds = array<i64: 4>, scalar_prefetch = 0 : i64, scratch_operands = 0 : i64, tpu.core_type = #tpu.core_type<tc>, window_params = [{transform_indices = @transform_0, window_bounds = array<i64: 128, 128>}, {pipeline_mode = #tpu.pipeline_mode<synchronous>, transform_indices = @transform_1, window_bounds = array<i64: 1, 128>}, {pipeline_mode = #tpu.pipeline_mode<synchronous>, transform_indices = @transform_2, window_bounds = array<i64: 1, 128>}, {transform_indices = @transform_3, window_bounds = array<i64: 128, 128>}]} {
    %c0 = arith.constant 0 : index
    %c0_0 = arith.constant 0 : index
    %0 = vector.load %arg1[%c0, %c0_0] : memref<128x128xf32, #tpu.memory_space<vmem>>, vector<128x128xf32>
    %c0_1 = arith.constant 0 : index
    %c0_2 = arith.constant 0 : index
    %1 = vector.load %arg2[%c0_1, %c0_2] : memref<1x128xf32, #tpu.memory_space<vmem>>, vector<1x128xf32>
    %2 = vector.broadcast %1 : vector<1x128xf32> to vector<128x128xf32>
    %3 = arith.mulf %0, %2 : vector<128x128xf32>
    %c0_3 = arith.constant 0 : index
    %c0_4 = arith.constant 0 : index
    %4 = vector.load %arg3[%c0_3, %c0_4] : memref<1x128xf32, #tpu.memory_space<vmem>>, vector<1x128xf32>
    %5 = vector.broadcast %4 : vector<1x128xf32> to vector<128x128xf32>
    %6 = arith.addf %3, %5 : vector<128x128xf32>
    %cst = arith.constant 5.000000e-01 : f32
    %7 = vector.broadcast %cst : f32 to vector<128x128xf32>
    %8 = arith.mulf %7, %6 : vector<128x128xf32>
    %cst_5 = arith.constant 0.707106769 : f32
    %9 = vector.broadcast %cst_5 : f32 to vector<128x128xf32>
    %10 = arith.mulf %6, %9 : vector<128x128xf32>
    %11 = math.erf %10 : vector<128x128xf32>
    %cst_6 = arith.constant 1.000000e+00 : f32
    %12 = vector.broadcast %cst_6 : f32 to vector<128x128xf32>
    %13 = arith.addf %12, %11 : vector<128x128xf32>
    %14 = arith.mulf %8, %13 : vector<128x128xf32>
    %c0_7 = arith.constant 0 : index
    %c0_8 = arith.constant 0 : index
    %15 = vector.load %arg4[%c0_7, %c0_8] : memref<128x128xf32, #tpu.memory_space<vmem>>, vector<128x128xf32>
    tpu.vector_store %arg4[%c0_7, %c0_8], %14 {strides = array<i32>} : memref<128x128xf32, #tpu.memory_space<vmem>>, vector<128x128xf32>,
    return
  }
  func.func @transform_0(%arg0: i32) -> (i32, i32) {
    %c0_i32 = arith.constant 0 : i32
    %c0_i32_0 = arith.constant 0 : i32
    return %arg0, %c0_i32 : i32, i32
  }
  func.func @transform_1(%arg0: i32) -> (i32, i32) {
    %c0_i32 = arith.constant 0 : i32
    %c0_i32_0 = arith.constant 0 : i32
    %c0_i32_1 = arith.constant 0 : i32
    return %c0_i32, %c0_i32_0 : i32, i32
  }
  func.func @transform_2(%arg0: i32) -> (i32, i32) {
    %c0_i32 = arith.constant 0 : i32
    %c0_i32_0 = arith.constant 0 : i32
    %c0_i32_1 = arith.constant 0 : i32
    return %c0_i32, %c0_i32_0 : i32, i32
  }
  func.func @transform_3(%arg0: i32) -> (i32, i32) {
    %c0_i32 = arith.constant 0 : i32
    %c0_i32_0 = arith.constant 0 : i32
    return %arg0, %c0_i32 : i32, i32
  }
}

</mosaic_0001>

<bundles_post_ra>
// kernel: cna_forward.3
= control target key start
LH: loop header
LB: loop body
LE: loop exit
PB: predicated region body
PF: predicated region fallthrough
CT: control target
= control target key end

     0   :  { %8 = vsyncpa [#allocation3], 0  ;;  %s1134_s0 = inlined_call_operand.hbm [shape: f32[512,128], index: 0, kind: input, shape index: {}]   ;;  %s1135_s1 = inlined_call_operand.hbm [shape: f32[1,128], index: 1, kind: input, shape index: {}]   ;;  %s1136_s2 = inlined_call_operand.hbm [shape: f32[1,128], index: 2, kind: input, shape index: {}]   ;;  %s1137_s3 = inlined_call_operand.hbm [shape: f32[512,128], index: 3, kind: output, shape index: {}]  }
   0x1   :  { %10 = vsyncpa [#allocation3 + $0x1], 0 }
   0x2   :  { %11 = vsyncpa [#allocation6], 0 }
   0x3   :  { %12 = vsyncpa [#allocation4], 0 }
   0x4   :  { %14 = vsyncpa [#allocation4 + $0x1], 0  ;;  %s791_s12 = smov 0   ;;  %s793_s13 = smov 0  }
   0x5   :  { %s795_s14 = smov 0   ;;  %s797_s15 = smov 0  }
   0x6 LB: > { %s812_s16 = sadd.s32 4294967295, %s761_s15   ;;  %s480_s17 = sadd.s32 4294967294, %s761_s15   ;;  %s761_s15 = sphi %s797_s15, %s1160_s15   ;;  %s757_s14 = sphi %s795_s14, %s1159_s14   ;;  %s753_s13 = sphi %s793_s13, %s1158_s13   ;;  %s749_s12 = sphi %s791_s12, %s1157_s12  }
   0x7   : > { %s816_s18 = sadd.s32 1, %s761_s15   ;;  %s27_s19 = sadd.s32 1, %s757_s14 }
   0x8   : > { %s24_s20 = ssub.s32 %s761_s15, %s816_s18  ;;  %p34_p0 = scmp.ne.s32.totalorder %s757_s14, %s753_s13 }
   0x9   : > { %p25_p1 = scmp.eq.s32.totalorder %s24_s20, 0  ;;  %p35_p2 = scmp.eq.s32.totalorder %s761_s15, 0 }
   0xa   : > { %p40_p3 = scmp.ne.s32.totalorder %s753_s13, %s749_s12  ;;  %p1138_p4 = scmp.eq.s32.totalorder %s812_s16, 0 }
   0xb   : > { %s828_s21 = scalar_select %p25_p1, %s757_s14, %s27_s19  }
   0xc   : > { %p830_p5 = por %p35_p2, %p34_p0  ;;  %p836_p6 = por %p1138_p4, %p40_p3 }
   0xd   : > { %p106_p7 = scmp.eq.s32.totalorder %s812_s16, 3  ;;  %p112_p8 = scmp.eq.s32.totalorder %s480_s17, 3 }
   0xe   : > { %s1144_s23 = scalar_select %p836_p6, 1, 0 }
   0xf   : > { %p481_p9 = scmp.ge.s32.totalorder %s761_s15, 1  ;;  %p119_p10 = scmp.lt.s32.totalorder %s761_s15, 5 }
  0x10   : > { %p843_p11 = por %p106_p7, %p34_p0  ;;  %p847_p12 = por %p112_p8, %p40_p3 }
  0x11   : > { %p851_p13 = pnand %p481_p9, %p119_p10  ;;  %s763_s27 = smov [#allocation5]  }
  0x12   : > { %s1145_s24 = scalar_select %p843_p11, 1, 0 }
  0x13   : > { %s1146_s25 = scalar_select %p847_p12, 1, 0 }
  0x14   : > { %s1147_s26 = scalar_select %p851_p13, 1, 0 }
  0x15   : > { %p514_p1 = pneg %p851_p13  ;;  %s132_s28 = sshll.u32 %s763_s27, 4  ;;  %s133_s28 = int_to_ptr.vmem [resolvable:$true] %s132_s28 }
  0x16   : > { %p531_p2 = scmp.lt.s32.totalorder %s761_s15, 4  ;;  %s764_s4 = smov [#allocation7]  }
  0x17   : > { %p860_p0 = pnand %p514_p1, %p1138_p4  ;;  %s143_s5 = sshll.u32 %s764_s4, 4  ;;  %s870_s5 = int_to_ptr.vmem [resolvable:$true] %s143_s5 }
  0x18   : > { %p866_p3 = pnand %p531_p2, %p830_p5  ;;  %s605_s8 = scalar_lea.hbm %s1135_s1, 16 }
  0x19   : > { %p606_p7 = scmp.ne.s32.totalorder %s1135_s1, %s605_s8  ;;  %p607_p8 = pneg %p860_p0 }
  0x1a   : > { %s1149_s30 = scalar_select %p866_p3, 1, 0 }
  0x1b   : > { %p608_p5 = pnand %p607_p8, %p606_p7  ;;  %p612_p10 = scmp.lt.u32.totalorder %s605_s8, %s1135_s1 }
  0x1d   : > { %p609_p9 = pneg %p608_p5 }
  0x1f   : > { %p614_p1 = pnand %p612_p10, %p609_p9 }
  0x21   : > { %617 = shalt.err (!%p614_p1)
}
  0x22   : > { %s618_s19 = scalar_lea.vmem %s133_s28, 16  ;;  %s625_s20 = scalar_lea.vmem %s133_s28, 32 }
  0x23   : > { %p619_p2 = scmp.ne.s32.totalorder %s133_s28, %s618_s19  ;;  %p626_p11 = scmp.lt.s32.totalorder %s133_s28, %s133_s28 }
  0x24   : > { %p627_p6 = scmp.lt.s32.totalorder %s625_s20, %s618_s19 }
  0x25   : > { %p621_p4 = pnand %p619_p2, %p607_p8 }
  0x26   : > { %p628_p13 = por %p627_p6, %p626_p11 }
  0x27   : > { %p622_p12 = pneg %p621_p4 }
  0x29   : > { %p629_p3 = pnand %p628_p13, %p622_p12 }
  0x2b   : > { %632 = shalt.err (!%p629_p3)
}
  0x2c   : > { %517 = dma.hbm_to_vmem [thread:$0]  (!%p860_p0), %s1135_s1, 16, %s133_s28, [#allocation6]  }
  0x2d   : > { %s154_s4 = sand.u32 1, %s757_s14   ;;  %s633_s8 = scalar_lea.hbm %s1136_s2, 16 }
  0x2e   : > { %p634_p4 = scmp.ne.s32.totalorder %s1136_s2, %s633_s8  ;;  %p640_p12 = scmp.lt.u32.totalorder %s633_s8, %s1136_s2 }
  0x30   : > { %p636_p6 = pnand %p634_p4, %p607_p8 }
  0x32   : > { %p637_p11 = pneg %p636_p6 }
  0x34   : > { %p642_p13 = pnand %p640_p12, %p637_p11 }
  0x36   : > { %645 = shalt.err (!%p642_p13)
}
  0x37   : > { %s646_s28 = scalar_lea.vmem %s870_s5, 16  ;;  %s653_s19 = scalar_lea.vmem %s870_s5, 32 }
  0x38   : > { %p647_p3 = scmp.ne.s32.totalorder %s870_s5, %s646_s28  ;;  %p654_p9 = scmp.lt.s32.totalorder %s870_s5, %s870_s5 }
  0x39   : > { %p655_p10 = scmp.lt.s32.totalorder %s653_s19, %s646_s28 }
  0x3a   : > { %p649_p7 = pnand %p647_p3, %p607_p8 }
  0x3b   : > { %p656_p1 = por %p655_p10, %p654_p9 }
  0x3c   : > { %p650_p5 = pneg %p649_p7 }
  0x3e   : > { %p657_p2 = pnand %p656_p1, %p650_p5 }
  0x40   : > { %660 = shalt.err (!%p657_p2)
}
  0x41   : > { %520 = dma.hbm_to_vmem [thread:$0]  (!%p860_p0), %s1136_s2, 16, %s870_s5, [#allocation6]  }
  0x42   : > { %s485_s27 = sshll.u32 %s154_s4, 7  ;;  %s500_s6 = sshll.u32 %s761_s15, 11 }
  0x43   : > { %s925_s9 = scalar_lea.hbm %s1134_s0, %s500_s6  ;;  %s158_s29 = scalar_lea.vmem [#allocation2], %s485_s27 }
  0x44   : > { %s165_s10 = sshll.u32 %s158_s29, 4  ;;  %s929_s11 = scalar_lea.sflag [#allocation3], %s154_s4  ;;  %s927_s10 = int_to_ptr.vmem [resolvable:$true] %s165_s10 }
  0x45   : > { %s661_s17 = scalar_lea.hbm %s925_s9, 2048  ;;  %p1150_p0 = scmp.ne.s32.totalorder %s1149_s30, 0 }
  0x46   : > { %p662_p8 = scmp.ne.s32.totalorder %s925_s9, %s661_s17  ;;  %s666_s19 = scalar_lea.hbm %s1134_s0, 8192 }
  0x47   : > { %p663_p4 = pneg %p1150_p0  ;;  %p667_p12 = scmp.lt.u32.totalorder %s925_s9, %s1134_s0 }
  0x48   : > { %p668_p13 = scmp.lt.u32.totalorder %s666_s19, %s661_s17  ;;  %p670_p7 = scmp.lt.u32.totalorder %s661_s17, %s925_s9 }
  0x49   : > { %p664_p6 = pnand %p663_p4, %p662_p8 }
  0x4a   : > { %p669_p3 = por %p668_p13, %p667_p12 }
  0x4b   : > { %p665_p11 = pneg %p664_p6 }
  0x4c   : > { %p671_p5 = por %p670_p7, %p669_p3 }
  0x4e   : > { %p672_p9 = pnand %p671_p5, %p665_p11 }
  0x50   : > { %675 = shalt.err (!%p672_p9)
}
  0x51   : > { %s676_s4 = scalar_lea.vmem %s927_s10, 2048  ;;  %s765_s27 = smov [#allocation2]  }
  0x52   : > { %p677_p10 = scmp.ne.s32.totalorder %s927_s10, %s676_s4  ;;  %s681_s6 = sshll.u32 %s765_s27, 4  ;;  %s682_s6 = int_to_ptr.vmem [resolvable:$false] %s681_s6 }
  0x53   : > { %s683_s7 = scalar_lea.vmem %s682_s6, 4096  ;;  %p684_p8 = scmp.lt.s32.totalorder %s927_s10, %s682_s6 }
  0x54   : > { %p679_p1 = pnand %p677_p10, %p663_p4  ;;  %p685_p6 = scmp.lt.s32.totalorder %s683_s7, %s676_s4 }
  0x56   : > { %p680_p2 = pneg %p679_p1  ;;  %p686_p12 = por %p685_p6, %p684_p8 }
  0x58   : > { %p687_p13 = pnand %p686_p12, %p680_p2 }
  0x5a   : > { %690 = shalt.err (!%p687_p13)
}
  0x5b   : > { %s766_s8 = smov 128   ;;  %s767_s29 = smov 8  }
  0x5c   : > { %524 = dma.hbm_to_vmem [thread:$0]  (!%p1150_p0), %s925_s9, 2048, %s927_s10, %s929_s11, %s766_s8, %s766_s8, %s767_s29  }
  0x5d   : > { %p1151_p4 = scmp.ne.s32.totalorder %s1147_s26, 0 }
  0x5e   : > { %s960_s17 = sand.u32 (!%p1151_p4), 1, %s753_s13   ;;  %p1152_p11 = scmp.ne.s32.totalorder (!%p1151_p4), %s1144_s23, 0 }
  0x5f   : > { %177 = sbr.rel (%p1151_p4) target bundleno = 159 (0x9f), region = 32  ;;  %s489_s5 = sshll.u32 (!%p1151_p4), %s960_s17, 7 }
  0x60   : > { %s180_s28 = scalar_lea.sflag (!%p1151_p4), [#allocation3], %s960_s17  ;;  %s966_s19 = scalar_lea.vmem (!%p1151_p4), [#allocation2], %s489_s5 }
  0x66   : > { %736 = dma.done.wait (%p1152_p11), %s180_s28, 2048  }
  0x67   : > { %738 = vsyncadd (%p1152_p11), %s180_s28, 4294965248  ;;  %p1153_p0 = scmp.eq.s32.totalorder %s812_s16, 0 }
  0x69   : > { %740 = dma.done.wait (%p1153_p0), [#allocation6], 32   ;;  %p1154_p3 = pmov %p1153_p0 }
  0x6a   : > { %v216_v0 = vld [vmem:[%s966_s19] sm:$0xff]  ;;  %v217_v4 = vld [vmem:[%s966_s19 + $0x8] sm:$0xff]  ;;  %v218_v5 = vld [vmem:[%s966_s19 + $0x10] sm:$0xff]  ;;  %s1056_s23 = scalar_lea.vmem [#allocation8], %s489_s5  ;;  %s501_s26 = sshll.u32 %s812_s16, 11 }
  0x6b   : > { %742 = vsyncadd (%p1154_p3), [#allocation6], 4294967264  ;;  %v977_v1 = vld [vmem:[#allocation5] ss:$0 sm:$0xff]  ;;  %v979_v2 = vld [vmem:[#allocation7] ss:$0 sm:$0xff]  ;;  %s1087_s11 = scalar_lea.hbm %s1137_s3, %s501_s26 }
  0x6c   : > { %v239_v3 = vmul.f32 %v977_v1, %v216_v0  ;;  %v219_v6 = vld [vmem:[%s966_s19 + $0x18] sm:$0xff]  ;;  %v240_v7 = vmul.f32 %v977_v1, %v217_v4  ;;  %v241_v8 = vmul.f32 %v977_v1, %v218_v5  ;;  %v220_v10 = vld [vmem:[%s966_s19 + $0x20] sm:$0xff]  ;;  %v221_v11 = vld [vmem:[%s966_s19 + $0x28] sm:$0xff]  ;;  %s388_s30 = sshll.u32 %s1056_s23, 4  ;;  %s375_s16 = scalar_lea.sflag [#allocation4], %s960_s17  ;;  %s1089_s30 = int_to_ptr.vmem [resolvable:$true] %s388_s30 }
  0x6d   : > { %v242_v9 = vmul.f32 %v977_v1, %v219_v6  ;;  %v222_v12 = vld [vmem:[%s966_s19 + $0x30] sm:$0xff]  ;;  %v243_v14 = vmul.f32 %v977_v1, %v220_v10  ;;  %v244_v15 = vmul.f32 %v977_v1, %v221_v11  ;;  %v223_v16 = vld [vmem:[%s966_s19 + $0x38] sm:$0xff]  ;;  %v224_v27 = vld [vmem:[%s966_s19 + $0x40] sm:$0xff]  ;;  %s691_s20 = scalar_lea.vmem %s1089_s30, 2048  ;;  %p1155_p5 = scmp.ne.s32.totalorder %s1145_s24, 0 }
  0x6e   : > { %v262_v13 = vadd.f32 %v979_v2, %v239_v3  ;;  %v263_v17 = vadd.f32 %v979_v2, %v240_v7  ;;  %v264_v18 = vadd.f32 %v979_v2, %v241_v8  ;;  %v245_v20 = vmul.f32 %v977_v1, %v222_v12  ;;  %v225_v29 = vld [vmem:[%s966_s19 + $0x48] sm:$0xff]  ;;  %v226_v30 = vld [vmem:[%s966_s19 + $0x50] sm:$0xff]  ;;  %v227_v31 = vld [vmem:[%s966_s19 + $0x58] sm:$0xff]  ;;  %p692_p7 = scmp.ne.s32.totalorder %s1089_s30, %s691_s20  ;;  %s768_s22 = smov [#allocation8]  }
  0x6f   : > { %v265_v19 = vadd.f32 %v979_v2, %v242_v9  ;;  %v266_v22 = vadd.f32 %v979_v2, %v243_v14  ;;  %v1001_v23 = vadd.f32 %v979_v2, %v244_v15  ;;  %v246_v24 = vmul.f32 %v977_v1, %v223_v16  ;;  %v228_v40 = vld [vmem:[%s966_s19 + $0x60] sm:$0xff]  ;;  %v229_v48 = vld [vmem:[%s966_s19 + $0x68] sm:$0xff]  ;;  %v230_v51 = vld [vmem:[%s966_s19 + $0x70] sm:$0xff]  ;;  %s695_s4 = sshll.u32 %s768_s22, 4  ;;  %s696_s4 = int_to_ptr.vmem [resolvable:$false] %s695_s4 }
  0x70   : > { %v294_v21 = vmul.f32 0.70710677, %v262_v13  ;;  %v295_v25 = vmul.f32 0.70710677, %v263_v17  ;;  %v296_v26 = vmul.f32 0.70710677, %v264_v18  ;;  %v268_v34 = vadd.f32 %v979_v2, %v245_v20  ;;  %p693_p9 = pnand %p692_p7, %p1155_p5  ;;  %p698_p1 = scmp.lt.s32.totalorder %s1089_s30, %s696_s4 }
  0x71   : > { %v297_v28 = vmul.f32 0.70710677, %v265_v19  ;;  %v298_v32 = vmul.f32 0.70710677, %v266_v22  ;;  %v299_v33 = vmul.f32 0.70710677, %v1001_v23  ;;  %v1011_v35 = vadd.f32 %v979_v2, %v246_v24 }
  0x72   : > { %573 = verf.f32 %v294_v21  ;;  %v247_v36 = vmul.f32 %v977_v1, %v224_v27  ;;  %v248_v37 = vmul.f32 %v977_v1, %v225_v29  ;;  %v249_v38 = vmul.f32 %v977_v1, %v226_v30  ;;  %v231_v52 = vld [vmem:[%s966_s19 + $0x78] sm:$0xff]  ;;  %p694_p10 = pneg %p693_p9  ;;  %s697_s27 = scalar_lea.vmem %s696_s4, 4096 }
  0x73   : > { %575 = verf.f32 %v295_v25  ;;  %v250_v39 = vmul.f32 %v977_v1, %v227_v31  ;;  %v300_v41 = vmul.f32 0.70710677, %v268_v34  ;;  %v301_v42 = vmul.f32 0.70710677, %v1011_v35  ;;  %p699_p2 = scmp.lt.s32.totalorder %s697_s27, %s691_s20 }
  0x74   : > { %577 = verf.f32 %v296_v26  ;;  %v1020_v43 = vadd.f32 %v979_v2, %v247_v36  ;;  %v1023_v44 = vadd.f32 %v979_v2, %v248_v37  ;;  %v1026_v45 = vadd.f32 %v979_v2, %v249_v38 }
  0x75   : > { %579 = verf.f32 %v297_v28  ;;  %v1029_v46 = vadd.f32 %v979_v2, %v250_v39  ;;  %v251_v47 = vmul.f32 %v977_v1, %v228_v40  ;;  %v278_v49 = vmul.f32 0.5, %v262_v13  ;;  %p700_p8 = por %p699_p2, %p698_p1 }
  0x76   : > { %581 = verf.f32 %v298_v32  ;;  %v302_v50 = vmul.f32 0.70710677, %v1020_v43  ;;  %v279_v53 = vmul.f32 0.5, %v263_v17  ;;  %v280_v54 = vmul.f32 0.5, %v264_v18 }
  0x77   : > { %583 = verf.f32 %v299_v33  ;;  %v303_v55 = vmul.f32 0.70710677, %v1023_v44  ;;  %v304_v56 = vmul.f32 0.70710677, %v1026_v45  ;;  %v305_v57 = vmul.f32 0.70710677, %v1029_v46  ;;  %p701_p6 = pnand %p700_p8, %p694_p10 }
  0x78   : > { %585 = verf.f32 %v300_v41  ;;  %v1040_v58 = vadd.f32 %v979_v2, %v251_v47  ;;  %v252_v59 = vmul.f32 %v977_v1, %v229_v48  ;;  %v281_v61 = vmul.f32 0.5, %v265_v19 }
  0x79   : > { %587 = verf.f32 %v301_v42  ;;  %v253_v62 = vmul.f32 %v977_v1, %v230_v51  ;;  %v254_v63 = vmul.f32 %v977_v1, %v231_v52  ;;  %v282_v4 = vmul.f32 0.5, %v266_v22 }
  0x7a   : > { %589 = verf.f32 %v302_v50  ;;  %v306_v5 = vmul.f32 0.70710677, %v1040_v58  ;;  %v275_v8 = vadd.f32 %v979_v2, %v252_v59  ;;  %v283_v16 = vmul.f32 0.5, %v1001_v23 }
  0x7b   : > { %591 = verf.f32 %v303_v55  ;;  %v1048_v9 = vadd.f32 %v979_v2, %v253_v62  ;;  %v1051_v1 = vadd.f32 %v979_v2, %v254_v63  ;;  %v284_v21 = vmul.f32 0.5, %v268_v34 }
  0x7c   : > { %v574_v60 = vpop.eup %573  ;;  %593 = verf.f32 %v304_v56  ;;  %v307_v17 = vmul.f32 0.70710677, %v275_v8  ;;  %v285_v25 = vmul.f32 0.5, %v1011_v35  ;;  %v286_v32 = vmul.f32 0.5, %v1020_v43 }
  0x7d   : > { %v576_v0 = vpop.eup %575  ;;  %v326_v3 = vadd.f32 1.0, %v574_v60  ;;  %595 = verf.f32 %v305_v57  ;;  %v308_v2 = vmul.f32 0.70710677, %v1048_v9  ;;  %v309_v29 = vmul.f32 0.70710677, %v1051_v1 }
  0x7e   : > { %v578_v6 = vpop.eup %577  ;;  %v327_v7 = vadd.f32 1.0, %v576_v0  ;;  %597 = verf.f32 %v306_v5  ;;  %v287_v35 = vmul.f32 0.5, %v1023_v44  ;;  %v288_v39 = vmul.f32 0.5, %v1026_v45 }
  0x7f   : > { %v580_v10 = vpop.eup %579  ;;  %v342_v11 = vmul.f32 %v326_v3, %v278_v49  ;;  %v328_v12 = vadd.f32 1.0, %v578_v6  ;;  %599 = verf.f32 %v307_v17  ;;  %v289_v42 = vmul.f32 0.5, %v1029_v46 }
  0x80   : > { %v582_v13 = vpop.eup %581  ;;  %v343_v14 = vmul.f32 %v327_v7, %v279_v53  ;;  %v329_v15 = vadd.f32 1.0, %v580_v10  ;;  %601 = verf.f32 %v308_v2  ;;  %v290_v44 = vmul.f32 0.5, %v1040_v58 }
  0x81   : > { %v584_v18 = vpop.eup %583  ;;  %358 = vst [vmem:[%s1056_s23] sm:$0xff] %v342_v11  ;;  %v344_v19 = vmul.f32 %v328_v12, %v280_v54  ;;  %v330_v20 = vadd.f32 1.0, %v582_v13  ;;  %603 = verf.f32 %v309_v29  ;;  %v291_v46 = vmul.f32 0.5, %v275_v8 }
  0x82   : > { %v586_v22 = vpop.eup %585  ;;  %359 = vst [vmem:[%s1056_s23 + $0x8] sm:$0xff] %v343_v14  ;;  %v345_v24 = vmul.f32 %v329_v15, %v281_v61  ;;  %v331_v23 = vadd.f32 1.0, %v584_v18  ;;  %v292_v56 = vmul.f32 0.5, %v1048_v9  ;;  %v293_v60 = vmul.f32 0.5, %v1051_v1 }
  0x83   : > { %v588_v26 = vpop.eup %587  ;;  %360 = vst [vmem:[%s1056_s23 + $0x10] sm:$0xff] %v344_v19  ;;  %v346_v27 = vmul.f32 %v330_v20, %v282_v4  ;;  %v332_v28 = vadd.f32 1.0, %v586_v22 }
  0x84   : > { %361 = vst [vmem:[%s1056_s23 + $0x18] sm:$0xff] %v345_v24  ;;  %v347_v30 = vmul.f32 %v331_v23, %v283_v16  ;;  %v333_v31 = vadd.f32 1.0, %v588_v26  ;;  %v590_v33 = vpop.eup %589 }
  0x85   : > { %362 = vst [vmem:[%s1056_s23 + $0x20] sm:$0xff] %v346_v27  ;;  %v348_v34 = vmul.f32 %v332_v28, %v284_v21  ;;  %v592_v36 = vpop.eup %591  ;;  %v334_v38 = vadd.f32 1.0, %v590_v33 }
  0x86   : > { %363 = vst [vmem:[%s1056_s23 + $0x28] sm:$0xff] %v347_v30  ;;  %v349_v37 = vmul.f32 %v333_v31, %v285_v25  ;;  %v594_v40 = vpop.eup %593  ;;  %v335_v41 = vadd.f32 1.0, %v592_v36 }
  0x87   : > { %364 = vst [vmem:[%s1056_s23 + $0x30] sm:$0xff] %v348_v34  ;;  %v596_v43 = vpop.eup %595  ;;  %v350_v47 = vmul.f32 %v334_v38, %v286_v32  ;;  %v336_v48 = vadd.f32 1.0, %v594_v40 }
  0x88   : > { %365 = vst [vmem:[%s1056_s23 + $0x38] sm:$0xff] %v349_v37  ;;  %v598_v49 = vpop.eup %597  ;;  %v351_v50 = vmul.f32 %v335_v41, %v287_v35  ;;  %v337_v51 = vadd.f32 1.0, %v596_v43 }
  0x89   : > { %366 = vst [vmem:[%s1056_s23 + $0x40] sm:$0xff] %v350_v47  ;;  %v352_v45 = vmul.f32 %v336_v48, %v288_v39  ;;  %v338_v52 = vadd.f32 1.0, %v598_v49  ;;  %v600_v54 = vpop.eup %599 }
  0x8a   : > { %367 = vst [vmem:[%s1056_s23 + $0x48] sm:$0xff] %v351_v50  ;;  %v353_v53 = vmul.f32 %v337_v51, %v289_v42  ;;  %v602_v57 = vpop.eup %601  ;;  %v339_v58 = vadd.f32 1.0, %v600_v54 }
  0x8b   : > { %368 = vst [vmem:[%s1056_s23 + $0x50] sm:$0xff] %v352_v45  ;;  %v354_v55 = vmul.f32 %v338_v52, %v290_v44  ;;  %v340_v59 = vadd.f32 1.0, %v602_v57  ;;  %v604_v61 = vpop.eup %603 }
  0x8c   : > { %369 = vst [vmem:[%s1056_s23 + $0x58] sm:$0xff] %v353_v53  ;;  %v355_v62 = vmul.f32 %v339_v58, %v291_v46  ;;  %v341_v0 = vadd.f32 1.0, %v604_v61 }
  0x8d   : > { %370 = vst [vmem:[%s1056_s23 + $0x60] sm:$0xff] %v354_v55  ;;  %v356_v63 = vmul.f32 %v340_v59, %v292_v56 }
  0x8e   : > { %371 = vst [vmem:[%s1056_s23 + $0x68] sm:$0xff] %v355_v62  ;;  %v357_v3 = vmul.f32 %v341_v0, %v293_v60 }
  0x8f   : > { %372 = vst [vmem:[%s1056_s23 + $0x70] sm:$0xff] %v356_v63 }
  0x90   : > { %373 = vst [vmem:[%s1056_s23 + $0x78] sm:$0xff] %v357_v3 }
  0x91   : > { %704 = shalt.err (!%p701_p6)
}
  0x92   : > { %s705_s6 = scalar_lea.hbm %s1087_s11, 2048  ;;  %s709_s29 = scalar_lea.hbm %s1137_s3, 8192 }
  0x93   : > { %p706_p12 = scmp.ne.s32.totalorder %s1087_s11, %s705_s6  ;;  %p710_p11 = scmp.lt.u32.totalorder %s1087_s11, %s1137_s3 }
  0x94   : > { %p711_p0 = scmp.lt.u32.totalorder %s709_s29, %s705_s6  ;;  %p713_p7 = scmp.lt.u32.totalorder %s705_s6, %s1087_s11 }
  0x95   : > { %p707_p13 = pnand %p706_p12, %p1155_p5 }
  0x96   : > { %p712_p3 = por %p711_p0, %p710_p11 }
  0x97   : > { %p708_p4 = pneg %p707_p13 }
  0x98   : > { %p714_p9 = por %p713_p7, %p712_p3 }
  0x9a   : > { %p715_p10 = pnand %p714_p9, %p708_p4 }
  0x9c   : > { %718 = shalt.err (!%p715_p10)
}
  0x9d   : > { %s769_s19 = smov 128   ;;  %s770_s23 = smov 8  }
  0x9e   : > { %512 = dma.vmem_to_hbm [thread:$0]  (%p1155_p5), %s1089_s30, 2048, %s1087_s11, %s375_s16, %s769_s19, %s769_s19, %s770_s23  }
  0x9f PF: > { %p534_p1 = scmp.ge.s32.totalorder %s761_s15, 2  ;;  %s403_s26 = sand.u32 1, %s749_s12  }
  0xa0   : > { %p1156_p2 = scmp.ne.s32.totalorder %s1146_s25, 0  ;;  %s404_s9 = scalar_lea.sflag [#allocation4], %s403_s26 }
  0xa2   : > { %p526_p8 = pnand %p534_p1, %p1156_p2 }
  0xa4   : > { %744 = dma.done.wait (!%p526_p8), %s404_s9, 2048  }
  0xa5   : > { %746 = vsyncadd (!%p526_p8), %s404_s9, 4294965248  ;;  %p17_p6 = scmp.ge.s32.totalorder %s816_s18, 6   ;;  %s1157_s12 = smov %s753_s13 }
  0xa6   : > { %s1158_s13 = smov %s757_s14  ;;  %s1159_s14 = smov %s828_s21 }
  0xa7   : > { %s1160_s15 = smov %s816_s18  ;;  %19 = sbr.rel (!%p17_p6) target bundleno = 6 (0x6), region = 85 }
  0xae   :  { %409 = vsyncpa [#allocation3], 1 }
  0xaf   :  { %411 = vsyncpa [#allocation3 + $0x1], 1 }
  0xb0   :  { %412 = vsyncpa [#allocation6], 1 }
  0xb1   :  { %413 = vsyncpa [#allocation4], 1 }
  0xb2   :  { %415 = vsyncpa [#allocation4 + $0x1], 1 }

// kernel: cna_forward.2
= control target key start
LH: loop header
LB: loop body
LE: loop exit
PB: predicated region body
PF: predicated region fallthrough
CT: control target
= control target key end

     0   :  { %9 = vsyncpa [#allocation3], 0  ;;  %s1350_s0 = inlined_call_operand.hbm [shape: f32[512,36], index: 0, kind: input, shape index: {}]   ;;  %s1351_s1 = inlined_call_operand.hbm [shape: f32[36,128], index: 1, kind: input, shape index: {}]   ;;  %s1352_s2 = inlined_call_operand.hbm [shape: f32[512,128], index: 2, kind: output, shape index: {0}]   ;;  %s1353_s3 = inlined_call_operand.hbm [shape: f32[4,2,128], index: 3, kind: output, shape index: {1}]  }
   0x1   :  { %11 = vsyncpa [#allocation3 + $0x1], 0 }
   0x2   :  { %12 = vsyncpa [#allocation6], 0 }
   0x3   :  { %13 = vsyncpa [#allocation4], 0 }
   0x4   :  { %15 = vsyncpa [#allocation4 + $0x1], 0 }
   0x5   :  { %16 = vsyncpa [#allocation9], 0 }
   0x6   :  { %18 = vsyncpa [#allocation9 + $0x1], 0  ;;  %s1022_s12 = smov 0   ;;  %s1024_s13 = smov 0  }
   0x7   :  { %s1026_s14 = smov 0   ;;  %s1028_s15 = smov 0  }
   0x8 LB: > { %s1043_s16 = sadd.s32 4294967295, %s992_s15   ;;  %s659_s17 = sadd.s32 4294967294, %s992_s15   ;;  %s992_s15 = sphi %s1028_s15, %s1372_s15   ;;  %s988_s14 = sphi %s1026_s14, %s1371_s14   ;;  %s984_s13 = sphi %s1024_s13, %s1370_s13   ;;  %s980_s12 = sphi %s1022_s12, %s1369_s12  }
   0x9   : > { %p44_p0 = scmp.ne.s32.totalorder %s984_s13, %s980_s12  ;;  %p1354_p1 = scmp.eq.s32.totalorder %s1043_s16, 0 }
   0xa   : > { %p95_p3 = scmp.eq.s32.totalorder %s659_s17, 3  ;;  %p660_p5 = scmp.ge.s32.totalorder %s992_s15, 1 }
   0xb   : > { %p1052_p4 = por %p1354_p1, %p44_p0  ;;  %p128_p7 = scmp.lt.s32.totalorder %s992_s15, 5 }
   0xc   : > { %p1057_p6 = por %p95_p3, %p44_p0  ;;  %s994_s21 = smov [#allocation5]  }
   0xd   : > { %s1357_s18 = scalar_select %p1052_p4, 1, 0 }
   0xe   : > { %s1358_s19 = scalar_select %p1057_p6, 1, 0 }
   0xf   : > { %p1062_p8 = pnand %p660_p5, %p128_p7  ;;  %s140_s22 = sshll.u32 %s994_s21, 4  ;;  %s141_s22 = int_to_ptr.vmem [resolvable:$true] %s140_s22 }
  0x10   : > { %s1075_s24 = sadd.s32 1, %s992_s15   ;;  %s31_s25 = sadd.s32 1, %s988_s14 }
  0x11   : > { %s1359_s20 = scalar_select %p1062_p8, 1, 0 }
  0x12   : > { %p776_p9 = pneg %p1062_p8  ;;  %s28_s26 = ssub.s32 %s992_s15, %s1075_s24 }
  0x13   : > { %s832_s29 = scalar_lea.hbm %s1351_s1, 640 }
  0x14   : > { %p1070_p10 = pnand %p776_p9, %p1354_p1  ;;  %p833_p11 = scmp.ne.s32.totalorder %s1351_s1, %s832_s29 }
  0x15   : > { %p839_p3 = scmp.lt.u32.totalorder %s832_s29, %s1351_s1 }
  0x16   : > { %p834_p12 = pneg %p1070_p10 }
  0x18   : > { %p835_p13 = pnand %p834_p12, %p833_p11 }
  0x1a   : > { %p836_p0 = pneg %p835_p13 }
  0x1c   : > { %p841_p5 = pnand %p839_p3, %p836_p0 }
  0x1e   : > { %844 = shalt.err (!%p841_p5)
}
  0x1f   : > { %s845_s7 = scalar_lea.vmem %s141_s22, 640  ;;  %p853_p2 = scmp.lt.s32.totalorder %s141_s22, %s141_s22 }
  0x20   : > { %p846_p7 = scmp.ne.s32.totalorder %s141_s22, %s845_s7  ;;  %p854_p6 = scmp.lt.s32.totalorder %s845_s7, %s845_s7 }
  0x22   : > { %p848_p9 = pnand %p846_p7, %p834_p12  ;;  %p855_p4 = por %p854_p6, %p853_p2 }
  0x24   : > { %p849_p1 = pneg %p848_p9 }
  0x26   : > { %p856_p8 = pnand %p855_p4, %p849_p1 }
  0x28   : > { %859 = shalt.err (!%p856_p8)
}
  0x29   : > { %s995_s8 = smov 128   ;;  %s996_s9 = smov 8  }
  0x2a   : > { %779 = dma.hbm_to_vmem [thread:$0]  (!%p1070_p10), %s1351_s1, 640, %s141_s22, [#allocation6], %s995_s8, %s995_s8, %s996_s9  }
  0x2b   : > { %p29_p1 = scmp.eq.s32.totalorder %s28_s26, 0  ;;  %p38_p2 = scmp.ne.s32.totalorder %s988_s14, %s984_s13 }
  0x2c   : > { %p39_p4 = scmp.eq.s32.totalorder %s992_s15, 0  ;;  %p792_p6 = scmp.lt.s32.totalorder %s992_s15, 4 }
  0x2d   : > { %s1104_s17 = scalar_select %p29_p1, %s988_s14, %s31_s25  }
  0x2e   : > { %p40_p8 = por %p39_p4, %p38_p2  ;;  %p1361_p11 = scmp.eq.s32.totalorder %s1043_s16, 3 }
  0x2f   : > { %s154_s23 = sand.u32 1, %s988_s14   ;;  %s695_s27 = sshll.u32 %s992_s15, 11 }
  0x30   : > { %p1108_p12 = por %p1361_p11, %p38_p2  ;;  %s663_s28 = sshll.u32 %s154_s23, 7 }
  0x31   : > { %s1117_s4 = scalar_lea.hbm %s1350_s0, %s695_s27  ;;  %s158_s22 = scalar_lea.vmem [#allocation2], %s663_s28 }
  0x32   : > { %s165_s25 = sshll.u32 %s158_s22, 4  ;;  %p1119_p10 = pnand %p792_p6, %p40_p8  ;;  %s1123_s25 = int_to_ptr.vmem [resolvable:$true] %s165_s25 }
  0x33   : > { %s1125_s5 = scalar_lea.sflag [#allocation3], %s154_s23  ;;  %s860_s6 = scalar_lea.hbm %s1117_s4, 2048 }
  0x34   : > { %p861_p13 = scmp.ne.s32.totalorder %s1117_s4, %s860_s6  ;;  %p862_p0 = pneg %p1119_p10 }
  0x35   : > { %s865_s11 = scalar_lea.hbm %s1350_s0, 8192  ;;  %p866_p7 = scmp.lt.u32.totalorder %s1117_s4, %s1350_s0 }
  0x36   : > { %p863_p3 = pnand %p862_p0, %p861_p13  ;;  %p867_p9 = scmp.lt.u32.totalorder %s865_s11, %s860_s6 }
  0x37   : > { %p869_p2 = scmp.lt.u32.totalorder %s860_s6, %s1117_s4 }
  0x38   : > { %p864_p5 = pneg %p863_p3  ;;  %p868_p1 = por %p867_p9, %p866_p7 }
  0x3a   : > { %p870_p4 = por %p869_p2, %p868_p1 }
  0x3c   : > { %p871_p6 = pnand %p870_p4, %p864_p5 }
  0x3e   : > { %874 = shalt.err (!%p871_p6)
}
  0x3f   : > { %s875_s23 = scalar_lea.vmem %s1123_s25, 2048  ;;  %s997_s29 = smov [#allocation2]  }
  0x40   : > { %p876_p8 = scmp.ne.s32.totalorder %s1123_s25, %s875_s23  ;;  %s880_s30 = sshll.u32 %s997_s29, 4  ;;  %s881_s30 = int_to_ptr.vmem [resolvable:$false] %s880_s30 }
  0x41   : > { %s882_s22 = scalar_lea.vmem %s881_s30, 4096  ;;  %p883_p3 = scmp.lt.s32.totalorder %s1123_s25, %s881_s30 }
  0x42   : > { %p878_p11 = pnand %p876_p8, %p862_p0  ;;  %p884_p7 = scmp.lt.s32.totalorder %s882_s22, %s875_s23 }
  0x44   : > { %p879_p13 = pneg %p878_p11  ;;  %p885_p9 = por %p884_p7, %p883_p3 }
  0x46   : > { %p886_p1 = pnand %p885_p9, %p879_p13 }
  0x48   : > { %889 = shalt.err (!%p886_p1)
}
  0x49   : > { %783 = dma.hbm_to_vmem [thread:$0]  (!%p1119_p10), %s1117_s4, 2048, %s1123_s25, %s1125_s5, %s995_s8, %s995_s8, %s996_s9  }
  0x4a   : > { %p1364_p0 = scmp.ne.s32.totalorder %s1359_s20, 0 }
  0x4b   : > { %s1159_s6 = sand.u32 (!%p1364_p0), 1, %s984_s13   ;;  %p1365_p5 = scmp.ne.s32.totalorder (!%p1364_p0), %s1357_s18, 0 }
  0x4c   : > { %177 = sbr.rel (%p1364_p0) target bundleno = 384 (0x180), region = 28  ;;  %s667_s7 = sshll.u32 (!%p1364_p0), %s1159_s6, 7 }
  0x4d   : > { %s180_s10 = scalar_lea.sflag (!%p1364_p0), [#allocation3], %s1159_s6  ;;  %s1165_s26 = scalar_lea.vmem (!%p1364_p0), [#allocation2], %s667_s7 }
  0x53   : > { %963 = dma.done.wait (%p1365_p5), %s180_s10, 2048  }
  0x54   : > { %965 = vsyncadd (%p1365_p5), %s180_s10, 4294965248  ;;  %p1366_p10 = scmp.eq.s32.totalorder %s1043_s16, 0 }
  0x56   : > { %967 = dma.done.wait (%p1366_p10), [#allocation6], 640   ;;  %p1367_p2 = pmov %p1366_p10 }
  0x57   : > { %vm238_vm0 = vcmask 293888   ;;  %v233_v0 = vld [vmem:[#allocation5] sm:$0xff]  ;;  %v234_v1 = vld [vmem:[#allocation5 + $0x8] sm:$0xff]  ;;  %v235_v2 = vld [vmem:[#allocation5 + $0x10] sm:$0xff]  ;;  %vm287_vm1 = vcmask 1043456   ;;  %s1211_s18 = scalar_lea.vmem [#allocation7], %s667_s7 }
  0x58   : > { %969 = vsyncadd (%p1367_p2), [#allocation6], 4294966656  ;;  %v752_v3 = vpack.c.bf16 %v234_v1, %v233_v0  ;;  %v236_v4 = vld [vmem:[#allocation5 + $0x18] sm:$0xff]  ;;  %v217_v5 = vld [vmem:[%s1165_s26] sm:$0xff]  ;;  %s696_s20 = sshll.u32 %s1043_s16, 11  ;;  %s531_s8 = sshll.u32 %s1211_s18, 4  ;;  %s1248_s8 = int_to_ptr.vmem [resolvable:$true] %s531_s8 }
  0x59   : > { %v756_v6 = vpack.c.bf16 %v236_v4, %v235_v2  ;;  %728 = vmatprep.mubr.msk.f32.mxu0 %vm238_vm0, %v217_v5  ;;  %v225_v7 = vld [vmem:[%s1165_s26 + $0x40] sm:$0xff]  ;;  %v218_v9 = vld [vmem:[%s1165_s26 + $0x8] sm:$0xff]  ;;  %v219_v11 = vld [vmem:[%s1165_s26 + $0x10] sm:$0xff]  ;;  %s1246_s25 = scalar_lea.hbm %s1352_s2, %s696_s20  ;;  %s513_s5 = scalar_lea.sflag [#allocation4], %s1159_s6 }
  0x5a   : > { %753 = vmatprep.subr.bf16.mxu0 %v752_v3  ;;  %760 = vmatprep.subr.bf16.mxu1 %v752_v3  ;;  %v237_v8 = vld [vmem:[#allocation5 + $0x20] sm:$0xf]  ;;  %v226_v10 = vld [vmem:[%s1165_s26 + $0x48] sm:$0xff]  ;;  %v227_v12 = vld [vmem:[%s1165_s26 + $0x50] sm:$0xff]  ;;  %s890_s11 = scalar_lea.vmem %s1248_s8, 2048  ;;  %s998_s27 = smov [#allocation7]  }
  0x5b   : > { %755 = vmatpush3.bf16.msra.mxu0 %v752_v3  ;;  %763 = vmatpush3.bf16.msra.mxu1 %v752_v3  ;;  %v220_v13 = vld [vmem:[%s1165_s26 + $0x18] sm:$0xff]  ;;  %v221_v15 = vld [vmem:[%s1165_s26 + $0x20] sm:$0xff]  ;;  %v222_v17 = vld [vmem:[%s1165_s26 + $0x28] sm:$0xff]  ;;  %p891_p4 = scmp.ne.s32.totalorder %s1248_s8, %s890_s11  ;;  %s894_s28 = sshll.u32 %s998_s27, 4  ;;  %s895_s28 = int_to_ptr.vmem [resolvable:$false] %s894_s28 }
  0x5c   : > { %757 = vmatprep.subr.bf16.mxu0 %v756_v6  ;;  %761 = vmatprep.subr.bf16.mxu1 %v756_v6  ;;  %v228_v14 = vld [vmem:[%s1165_s26 + $0x58] sm:$0xff]  ;;  %v229_v16 = vld [vmem:[%s1165_s26 + $0x60] sm:$0xff]  ;;  %v230_v18 = vld [vmem:[%s1165_s26 + $0x68] sm:$0xff]  ;;  %s896_s23 = scalar_lea.vmem %s895_s28, 4096  ;;  %p897_p11 = scmp.lt.s32.totalorder %s1248_s8, %s895_s28 }
  0x5d   : > { %740 = vmatprep.mubr.msk.f32.mxu1 %vm238_vm0, %v225_v7  ;;  %v223_v19 = vld [vmem:[%s1165_s26 + $0x30] sm:$0xff]  ;;  %v224_v21 = vld [vmem:[%s1165_s26 + $0x38] sm:$0xff]  ;;  %p892_p6 = pnand %p891_p4, %p1108_p12  ;;  %p898_p13 = scmp.lt.s32.totalorder %s896_s23, %s890_s11 }
  0x5e   : > { %v231_v20 = vld [vmem:[%s1165_s26 + $0x70] sm:$0xff]  ;;  %v232_v22 = vld [vmem:[%s1165_s26 + $0x78] sm:$0xff] }
  0x5f   : > { %759 = vmatpush3.bf16.msra.mxu0 %v756_v6  ;;  %764 = vmatpush3.bf16.msra.mxu1 %v756_v6  ;;  %p893_p8 = pneg %p892_p6  ;;  %p899_p3 = por %p898_p13, %p897_p11 }
  0x60   : > { %726 = vmatprep.subr.msk.mxu0 %vm287_vm1, %v237_v8  ;;  %762 = vmatprep.subr.msk.mxu1 %vm287_vm1, %v237_v8 }
  0x61   : > { %p900_p7 = pnand %p899_p3, %p893_p8 }
  0x63   : > { %727 = vmatpush3.msk.msra.mxu0 %vm287_vm1, %v237_v8  ;;  %765 = vmatpush3.msk.msra.mxu1 %vm287_vm1, %v237_v8 }
  0x64   : > { %729 = vmatmul.mubr.msk.f32.vlgmr.msra.gmra.mrb[0].mxu0 %vm238_vm0, %v218_v9  ;;  %741 = vmatmul.mubr.msk.f32.vlgmr.msra.gmra.mrb[0].mxu1 %vm238_vm0, %v226_v10 }
  0x65   : > { %731 = vmatprep.mubr.msk.f32.mxu0 %vm238_vm0, %v219_v11  ;;  %743 = vmatprep.mubr.msk.f32.mxu1 %vm238_vm0, %v227_v12 }
  0x68   : > { %732 = vmatmul.mubr.msk.f32.gmra.mrb[2].mxu0 %vm238_vm0, %v220_v13  ;;  %744 = vmatmul.mubr.msk.f32.gmra.mrb[2].mxu1 %vm238_vm0, %v228_v14 }
  0x69   : > { %734 = vmatprep.mubr.msk.f32.mxu0 %vm238_vm0, %v221_v15  ;;  %746 = vmatprep.mubr.msk.f32.mxu1 %vm238_vm0, %v229_v16 }
  0x6c   : > { %735 = vmatmul.mubr.msk.f32.gmra.mrb[4].mxu0 %vm238_vm0, %v222_v17  ;;  %747 = vmatmul.mubr.msk.f32.gmra.mrb[4].mxu1 %vm238_vm0, %v230_v18 }
  0x6d   : > { %737 = vmatprep.mubr.msk.f32.mxu0 %vm238_vm0, %v223_v19  ;;  %749 = vmatprep.mubr.msk.f32.mxu1 %vm238_vm0, %v231_v20 }
  0x70   : > { %738 = vmatmul.mubr.msk.f32.gmra.mrb[6].mxu0 %vm238_vm0, %v224_v21  ;;  %750 = vmatmul.mubr.msk.f32.gmra.mrb[6].mxu1 %vm238_vm0, %v232_v22 }
 0x137   : > { %v730_v23 = vpop.f32.mrb[0].mxu0  ;;  %v1207_v24 = vpop.f32.mrb[0].mxu1 }
 0x138   : > { %437 = vst [vmem:[%s1211_s18 + $0x8] sm:$0xff] %v730_v23  ;;  %v475_v25 = vmul.f32 %v730_v23, %v730_v23  ;;  %v357_v26 = vpop.f32.mrb[1].mxu0  ;;  %445 = vst [vmem:[%s1211_s18 + $0x48] sm:$0xff] %v1207_v24  ;;  %v1216_v27 = vpop.f32.mrb[1].mxu1 }
 0x139   : > { %436 = vst [vmem:[%s1211_s18] sm:$0xff] %v357_v26  ;;  %v452_v28 = vadd.f32 %v730_v23, %v357_v26  ;;  %v474_v29 = vmul.f32 %v357_v26, %v357_v26  ;;  %444 = vst [vmem:[%s1211_s18 + $0x40] sm:$0xff] %v1216_v27 }
 0x13b   : > { %v490_v30 = vadd.f32 %v475_v25, %v474_v29  ;;  %v733_v31 = vpop.f32.mrb[2].mxu0  ;;  %v1221_v32 = vpop.f32.mrb[2].mxu1 }
 0x13c   : > { %439 = vst [vmem:[%s1211_s18 + $0x18] sm:$0xff] %v733_v31  ;;  %v367_v33 = vpop.f32.mrb[3].mxu0  ;;  %447 = vst [vmem:[%s1211_s18 + $0x58] sm:$0xff] %v1221_v32  ;;  %v1226_v34 = vpop.f32.mrb[3].mxu1  ;;  %v477_v37 = vmul.f32 %v733_v31, %v733_v31 }
 0x13d   : > { %438 = vst [vmem:[%s1211_s18 + $0x10] sm:$0xff] %v367_v33  ;;  %v453_v35 = vadd.f32 %v452_v28, %v367_v33  ;;  %v476_v36 = vmul.f32 %v367_v33, %v367_v33  ;;  %446 = vst [vmem:[%s1211_s18 + $0x50] sm:$0xff] %v1226_v34 }
 0x13f   : > { %v491_v38 = vadd.f32 %v490_v30, %v476_v36  ;;  %v736_v39 = vpop.f32.mrb[4].mxu0  ;;  %v454_v40 = vadd.f32 %v733_v31, %v453_v35  ;;  %v1231_v41 = vpop.f32.mrb[4].mxu1 }
 0x140   : > { %441 = vst [vmem:[%s1211_s18 + $0x28] sm:$0xff] %v736_v39  ;;  %v377_v42 = vpop.f32.mrb[5].mxu0  ;;  %449 = vst [vmem:[%s1211_s18 + $0x68] sm:$0xff] %v1231_v41  ;;  %v1238_v43 = vpop.f32.mrb[5].mxu1  ;;  %v479_v47 = vmul.f32 %v736_v39, %v736_v39 }
 0x141   : > { %440 = vst [vmem:[%s1211_s18 + $0x20] sm:$0xff] %v377_v42  ;;  %v455_v44 = vadd.f32 %v454_v40, %v377_v42  ;;  %v478_v45 = vmul.f32 %v377_v42, %v377_v42  ;;  %v492_v46 = vadd.f32 %v491_v38, %v477_v37  ;;  %448 = vst [vmem:[%s1211_s18 + $0x60] sm:$0xff] %v1238_v43 }
 0x143   : > { %v493_v48 = vadd.f32 %v492_v46, %v478_v45  ;;  %v739_v49 = vpop.f32.mrb[6].mxu0  ;;  %v456_v50 = vadd.f32 %v736_v39, %v455_v44  ;;  %v1250_v51 = vpop.f32.mrb[6].mxu1 }
 0x144   : > { %443 = vst [vmem:[%s1211_s18 + $0x38] sm:$0xff] %v739_v49  ;;  %v387_v52 = vpop.f32.mrb[7].mxu0  ;;  %451 = vst [vmem:[%s1211_s18 + $0x78] sm:$0xff] %v1250_v51  ;;  %v427_v53 = vpop.f32.mrb[7].mxu1 }
 0x145   : > { %442 = vst [vmem:[%s1211_s18 + $0x30] sm:$0xff] %v387_v52  ;;  %v457_v54 = vadd.f32 %v456_v50, %v387_v52  ;;  %v480_v55 = vmul.f32 %v387_v52, %v387_v52  ;;  %v494_v56 = vadd.f32 %v493_v48, %v479_v47  ;;  %450 = vst [vmem:[%s1211_s18 + $0x70] sm:$0xff] %v427_v53 }
 0x146   : > { %903 = shalt.err (!%p900_p7)
}
 0x147   : > { %s904_s29 = scalar_lea.hbm %s1246_s25, 2048  ;;  %s908_s7 = scalar_lea.hbm %s1352_s2, 8192 }
 0x148   : > { %p905_p9 = scmp.ne.s32.totalorder %s1246_s25, %s904_s29  ;;  %p909_p5 = scmp.lt.u32.totalorder %s1246_s25, %s1352_s2 }
 0x149   : > { %p910_p10 = scmp.lt.u32.totalorder %s908_s7, %s904_s29  ;;  %p912_p4 = scmp.lt.u32.totalorder %s904_s29, %s1246_s25 }
 0x14a   : > { %p906_p1 = pnand %p905_p9, %p1108_p12 }
 0x14b   : > { %p911_p2 = por %p910_p10, %p909_p5 }
 0x14c   : > { %p907_p0 = pneg %p906_p1 }
 0x14d   : > { %p913_p6 = por %p912_p4, %p911_p2 }
 0x14f   : > { %p914_p8 = pnand %p913_p6, %p907_p0 }
 0x151   : > { %917 = shalt.err (!%p914_p8)
}
 0x152   : > { %s999_s18 = smov 128   ;;  %s1000_s20 = smov 8   ;;  %v481_v57 = vmul.f32 %v739_v49, %v739_v49  ;;  %v458_v58 = vadd.f32 %v739_v49, %v457_v54  ;;  %v495_v59 = vadd.f32 %v494_v56, %v480_v55  ;;  %v482_v60 = vmul.f32 %v1216_v27, %v1216_v27 }
 0x153   : > { %772 = dma.vmem_to_hbm [thread:$0]  (%p1108_p12), %s1248_s8, 2048, %s1246_s25, %s513_s5, %s999_s18, %s999_s18, %s1000_s20   ;;  %v483_v63 = vmul.f32 %v1207_v24, %v1207_v24  ;;  %v484_v2 = vmul.f32 %v1226_v34, %v1226_v34  ;;  %v485_v5 = vmul.f32 %v1221_v32, %v1221_v32  ;;  %v486_v8 = vmul.f32 %v1238_v43, %v1238_v43 }
 0x154   : > { %v496_v61 = vadd.f32 %v495_v59, %v481_v57  ;;  %v459_v62 = vadd.f32 %v458_v58, %v1216_v27  ;;  %v487_v11 = vmul.f32 %v1231_v41, %v1231_v41  ;;  %v488_v14 = vmul.f32 %v427_v53, %v427_v53  ;;  %s670_s8 = sshll.u32 %s1159_s6, 1  ;;  %s692_s9 = sshll.u32 %s1043_s16, 5 }
 0x155   : > { %v489_v17 = vmul.f32 %v1250_v51, %v1250_v51  ;;  %s214_s4 = scalar_lea.vmem [#allocation8], %s670_s8  ;;  %s1307_s27 = scalar_lea.hbm %s1353_s3, %s692_s9 }
 0x156   : > { %v497_v0 = vadd.f32 %v496_v61, %v482_v60  ;;  %v460_v1 = vadd.f32 %v1207_v24, %v459_v62  ;;  %s547_s25 = sshll.u32 %s214_s4, 4  ;;  %s518_s28 = scalar_lea.sflag [#allocation9], %s1159_s6  ;;  %s1309_s25 = int_to_ptr.vmem [resolvable:$true] %s547_s25 }
 0x157   : > { %s918_s23 = scalar_lea.vmem %s1309_s25, 32  ;;  %s1001_s16 = smov [#allocation8]  }
 0x158   : > { %v461_v3 = vadd.f32 %v460_v1, %v1226_v34  ;;  %v498_v4 = vadd.f32 %v497_v0, %v483_v63  ;;  %p919_p11 = scmp.ne.s32.totalorder %s1309_s25, %s918_s23  ;;  %s922_s29 = sshll.u32 %s1001_s16, 4  ;;  %s923_s29 = int_to_ptr.vmem [resolvable:$false] %s922_s29 }
 0x159   : > { %s924_s30 = scalar_lea.vmem %s923_s29, 64  ;;  %p925_p7 = scmp.lt.s32.totalorder %s1309_s25, %s923_s29 }
 0x15a   : > { %v499_v6 = vadd.f32 %v498_v4, %v484_v2  ;;  %v462_v7 = vadd.f32 %v1221_v32, %v461_v3  ;;  %p920_p13 = pnand %p919_p11, %p1108_p12  ;;  %p926_p9 = scmp.lt.s32.totalorder %s924_s30, %s918_s23 }
 0x15c   : > { %v463_v9 = vadd.f32 %v462_v7, %v1238_v43  ;;  %v500_v10 = vadd.f32 %v499_v6, %v485_v5  ;;  %p921_p3 = pneg %p920_p13  ;;  %p927_p1 = por %p926_p9, %p925_p7 }
 0x15e   : > { %v501_v12 = vadd.f32 %v500_v10, %v486_v8  ;;  %v464_v13 = vadd.f32 %v1231_v41, %v463_v9  ;;  %p928_p0 = pnand %p927_p1, %p921_p3 }
 0x160   : > { %v465_v15 = vadd.f32 %v464_v13, %v427_v53  ;;  %v502_v16 = vadd.f32 %v501_v12, %v487_v11 }
 0x162   : > { %v466_v18 = vadd.f32 %v1250_v51, %v465_v15  ;;  %v503_v19 = vadd.f32 %v502_v16, %v488_v14 }
 0x164   : > { %v467_v20 = vrot.slane %v466_v18, 4  ;;  %v504_v21 = vadd.f32 %v503_v19, %v489_v17 }
 0x166   : > { %v468_v22 = vadd.f32 %v467_v20, %v466_v18  ;;  %v505_v23 = vrot.slane %v504_v21, 4 }
 0x168   : > { %v469_v24 = vrot.slane %v468_v22, 2  ;;  %v506_v25 = vadd.f32 %v505_v23, %v504_v21 }
 0x16a   : > { %v470_v26 = vadd.f32 %v469_v24, %v468_v22  ;;  %v507_v27 = vrot.slane %v506_v25, 2 }
 0x16c   : > { %v471_v28 = vrot.slane %v470_v26, 1  ;;  %v508_v29 = vadd.f32 %v507_v27, %v506_v25 }
 0x16e   : > { %v472_v30 = vadd.f32 %v471_v28, %v470_v26  ;;  %v509_v31 = vrot.slane %v508_v29, 1 }
 0x170   : > { %v510_v32 = vadd.f32 %v509_v31, %v508_v29  ;;  %473 = vst [vmem:[%s214_s4] sm:$0x1] %v472_v30 }
 0x172   : > { %511 = vst [vmem:[%s214_s4 + $0x1] sm:$0x1] %v510_v32 }
 0x173   : > { %931 = shalt.err (!%p928_p0)
}
 0x174   : > { %s932_s6 = scalar_lea.hbm %s1307_s27, 32  ;;  %s936_s10 = scalar_lea.hbm %s1353_s3, 128 }
 0x175   : > { %p933_p5 = scmp.ne.s32.totalorder %s1307_s27, %s932_s6  ;;  %p937_p4 = scmp.lt.u32.totalorder %s1307_s27, %s1353_s3 }
 0x176   : > { %p938_p6 = scmp.lt.u32.totalorder %s936_s10, %s932_s6  ;;  %p940_p11 = scmp.lt.u32.totalorder %s932_s6, %s1307_s27 }
 0x177   : > { %p934_p10 = pnand %p933_p5, %p1108_p12 }
 0x178   : > { %p939_p8 = por %p938_p6, %p937_p4 }
 0x179   : > { %p935_p2 = pneg %p934_p10 }
 0x17a   : > { %p941_p13 = por %p940_p11, %p939_p8 }
 0x17c   : > { %p942_p3 = pnand %p941_p13, %p935_p2 }
 0x17e   : > { %945 = shalt.err (!%p942_p3)
}
 0x17f   : > { %773 = dma.vmem_to_hbm [thread:$0]  (%p1108_p12), %s1309_s25, 32, %s1307_s27, %s518_s28  }
 0x180 PF: > { %p794_p7 = scmp.ge.s32.totalorder %s992_s15, 2  ;;  %s559_s20 = sand.u32 1, %s980_s12  }
 0x181   : > { %p1368_p9 = scmp.ne.s32.totalorder %s1358_s19, 0  ;;  %s560_s8 = scalar_lea.sflag [#allocation4], %s559_s20 }
 0x183   : > { %p785_p1 = pnand %p794_p7, %p1368_p9 }
 0x185   : > { %971 = dma.done.wait (!%p785_p1), %s560_s8, 2048  }
 0x186   : > { %973 = vsyncadd (!%p785_p1), %s560_s8, 4294965248  ;;  %s569_s9 = scalar_lea.sflag [#allocation9], %s559_s20 }
 0x187   : > { %975 = dma.done.wait (!%p785_p1), %s569_s9, 32  }
 0x188   : > { %977 = vsyncadd (!%p785_p1), %s569_s9, 4294967264  ;;  %p21_p12 = scmp.ge.s32.totalorder %s1075_s24, 6   ;;  %s1369_s12 = smov %s984_s13 }
 0x189   : > { %s1370_s13 = smov %s988_s14  ;;  %s1371_s14 = smov %s1104_s17 }
 0x18a   : > { %s1372_s15 = smov %s1075_s24  ;;  %23 = sbr.rel (!%p21_p12) target bundleno = 8 (0x8), region = 94 }
 0x191   :  { %574 = vsyncpa [#allocation3], 1 }
 0x192   :  { %576 = vsyncpa [#allocation3 + $0x1], 1 }
 0x193   :  { %577 = vsyncpa [#allocation6], 1 }
 0x194   :  { %578 = vsyncpa [#allocation4], 1 }
 0x195   :  { %580 = vsyncpa [#allocation4 + $0x1], 1 }
 0x196   :  { %581 = vsyncpa [#allocation9], 1 }
 0x197   :  { %583 = vsyncpa [#allocation9 + $0x1], 1 }

</bundles_post_ra>
